<compile_context>
chip_gen: v7x
topology: tpu7x:2x2x1
jax: 0.10.0
libtpu: 0.0.40
codegen_flags: <defaults>
</compile_context>

<pallas_src>
import functools

import jax
import jax.numpy as jnp
from jax.experimental import pallas as pl
from jax.experimental.pallas import tpu as pltpu


# ----------------------------------------------------------------------------
# Fused LSTM kernel: per-chunk input GEMM + sequential recurrence
# ----------------------------------------------------------------------------
def lstm_decoder_kernel(x_ref, wih_ref, whh_ref, b_ref, h0_ref, c0_ref,
                        out_ref, cN_ref, gx_scr, h_scr, c_scr,
                        *, t_tile, hidden, batch):
    H, B = hidden, batch
    chunk = pl.program_id(0)

    # Initialise recurrent state from the provided (encoder / incremental) state.
    @pl.when(chunk == 0)
    def _():
        h_scr[...] = h0_ref[...].astype(jnp.float32)
        c_scr[...] = c0_ref[...].astype(jnp.float32)

    # Fused input projection for the whole chunk: one (t_tile*B, H) x (H, 4H)
    # MXU GEMM (big M).  x is time-major, so step k's gates live in the
    # contiguous rows [k*B, (k+1)*B) of gx_scr.
    gx_scr[...] = (jnp.dot(x_ref[...], wih_ref[...],
                           preferred_element_type=jnp.float32)
                   + b_ref[...].astype(jnp.float32))

    h = h_scr[...]                      # (B, H) f32
    c = c_scr[...]                      # (B, H) f32
    whh = whh_ref[...]                  # (H, 4H), native dtype (no upcast)

    # Statically unrolled inner time loop over the chunk.
    for k in range(t_tile):
        gx_k = gx_scr[pl.ds(k * B, B), :]                      # contiguous slab
        gates = gx_k + jnp.dot(h.astype(whh.dtype), whh,
                               preferred_element_type=jnp.float32)
        # Gate layout (after wrapper permutation): [ i | f | o | g ].
        ifo = jax.nn.sigmoid(gates[:, :3 * H])                 # one EUP dispatch
        g_g = jnp.tanh(gates[:, 3 * H:])
        c = ifo[:, H:2 * H] * c + ifo[:, :H] * g_g             # f*c + i*g
        h = ifo[:, 2 * H:] * jnp.tanh(c)                       # o*tanh(c)
        # Per-step lane store (no concatenate, flat vreg pressure).
        out_ref[:, k * H:(k + 1) * H] = h.astype(out_ref.dtype)

    h_scr[...] = h
    c_scr[...] = c

    # Final cell state written once, on the last chunk (axis is "arbitrary").
    @pl.when(chunk == pl.num_programs(0) - 1)
    def _():
        cN_ref[...] = c.astype(cN_ref.dtype)


# ----------------------------------------------------------------------------
# Tiling helpers
# ----------------------------------------------------------------------------
def _pick_time_tile(t, b, h, cap=32):
    """Pick a time-chunk size that (a) divides T, (b) yields legal blocks
    ((t_tile*B) % 8 == 0 for the input, (t_tile*H) % 128 == 0 for the
    lane-dense output), and (c) is bounded (no unbounded full-T unroll)."""
    def aligned(d):
        return (d * b) % 8 == 0 and (d * h) % 128 == 0
    divisors = [d for d in range(1, t + 1) if t % d == 0]
    good = [d for d in divisors if aligned(d)]
    in_cap = [d for d in good if d <= cap]
    if in_cap:
        return in_cap[-1]        # largest aligned divisor within the cap
    if good:
        return good[0]           # smallest aligned divisor (bounds the unroll)
    # TODO(synk): pad T / H at production shapes instead of full-extent blocks.
    return t


def _const_spec(shape, index_map):
    """Single-buffer a block whose index never changes (halves its VMEM);
    fall back to a default BlockSpec if pipeline_mode is unavailable."""
    try:
        return pl.BlockSpec(shape, index_map, pipeline_mode=pl.Buffered(1))
    except Exception:  # pragma: no cover - API without pipeline_mode/Buffered
        return pl.BlockSpec(shape, index_map)


# ----------------------------------------------------------------------------
# Wrapper: LSTM over a time-major activation tensor
# ----------------------------------------------------------------------------
def lstm_pallas(embedded_tbh, w_ih, w_hh, b_ih, b_hh, h0, c0, *, t_tile_cap=32):
    """embedded_tbh: (T, B, H) time-major.  Weights in PyTorch layout
    (4H, H) / (4H,), gate order [i, f, g, o].  h0/c0: (B, H).
    Returns (output (B, T, H), h_n (B, H), c_n (B, H))."""
    T, B, H = embedded_tbh.shape
    dtype = embedded_tbh.dtype

    # Permute PyTorch gate order [i, f, g, o] -> [i, f, o, g] so the kernel
    # applies one sigmoid over a contiguous 3H slab and one tanh over H.
    def perm(w):
        return jnp.concatenate([w[:2 * H], w[3 * H:], w[2 * H:3 * H]], axis=0)

    wih_t = jnp.transpose(perm(w_ih))                 # (H, 4H)
    whh_t = jnp.transpose(perm(w_hh))                 # (H, 4H)
    bias = perm(b_ih + b_hh).reshape(1, 4 * H).astype(jnp.float32)
    # TODO(synk): cast wih_t / whh_t to bf16 at production H (MXU native rate).

    t_tile = _pick_time_tile(T, B, H, cap=t_tile_cap)
    n_chunks = T // t_tile

    # Time-major flat view: rows t*B + b are contiguous per chunk (free reshape).
    x2d = embedded_tbh.reshape(T * B, H)

    kernel = functools.partial(lstm_decoder_kernel,
                               t_tile=t_tile, hidden=H, batch=B)

    # Explicit VMEM budget (blocks + scratch, 2x headroom), clamped.
    itemsize = jnp.dtype(dtype).itemsize
    blk_bytes = (
        2 * t_tile * B * H * itemsize            # x chunk (double-buffered)
        + 2 * H * 4 * H * itemsize               # W_ih^T + W_hh^T (single-buffered)
        + 4 * H * 4                              # bias (f32)
        + 2 * 2 * B * H * itemsize               # h0, c0
        + 2 * B * t_tile * H * itemsize          # output chunk (double-buffered)
        + 2 * B * H * itemsize                   # c_n block
        + (t_tile * B * 4 * H + 2 * B * H) * 4   # f32 scratch (gx, h, c)
    )
    vmem_limit = int(min(max(2 * blk_bytes, 32 << 20), 100 << 20))

    out_flat, c_n = pl.pallas_call(
        kernel,
        out_shape=(
            jax.ShapeDtypeStruct((B, T * H), dtype),
            jax.ShapeDtypeStruct((B, H), dtype),
        ),
        grid_spec=pltpu.PrefetchScalarGridSpec(
            num_scalar_prefetch=0,
            grid=(n_chunks,),
            in_specs=[
                pl.BlockSpec((t_tile * B, H), lambda c: (c, 0)),   # embedded chunk
                _const_spec((H, 4 * H), lambda c: (0, 0)),         # W_ih^T
                _const_spec((H, 4 * H), lambda c: (0, 0)),         # W_hh^T
                _const_spec((1, 4 * H), lambda c: (0, 0)),         # bias
                pl.BlockSpec((B, H), lambda c: (0, 0)),            # h0
                pl.BlockSpec((B, H), lambda c: (0, 0)),            # c0
            ],
            out_specs=[
                pl.BlockSpec((B, t_tile * H), lambda c: (0, c)),   # lane-dense out
                pl.BlockSpec((B, H), lambda c: (0, 0)),            # c_n
            ],
            scratch_shapes=[
                pltpu.VMEM((t_tile * B, 4 * H), jnp.float32),      # chunk gates_x
                pltpu.VMEM((B, H), jnp.float32),                   # h state
                pltpu.VMEM((B, H), jnp.float32),                   # c state
            ],
        ),
        compiler_params=pltpu.CompilerParams(
            dimension_semantics=("arbitrary",),
            vmem_limit_bytes=vmem_limit),
    )(x2d, wih_t, whh_t, bias, h0, c0)

    output = out_flat.reshape(B, T, H)                # free contiguous reshape
    h_n = output[:, -1, :]                            # 1-layer LSTM: h_n == last step
    return output, h_n, c_n


# ----------------------------------------------------------------------------
# Decoder.forward
# ----------------------------------------------------------------------------
def decoder_forward(params, tokens, encoder_state, incr_state=None):
    """Mirrors Decoder.forward.
    tokens: (B, T) int32; encoder_state / incr_state: (h, c) each (1, B, H).
    Returns (output (B, T, H), (h_n (1,B,H), c_n (1,B,H)))."""
    emb_table, w_ih, w_hh, b_ih, b_hh = params
    # Gather directly into time-major (T, B, H): only the tiny (B, T) id matrix
    # is transposed, never the big activation tensor.
    embedded_tbh = jnp.take(emb_table, jnp.transpose(tokens), axis=0)
    state = encoder_state if incr_state is None else incr_state
    h0, c0 = state
    output, h_n, c_n = lstm_pallas(embedded_tbh, w_ih, w_hh, b_ih, b_hh,
                                   h0[0], c0[0])
    return output, (h_n[None], c_n[None])


# ----------------------------------------------------------------------------
# Pure-JAX reference (PyTorch LSTM semantics) for correctness check
# ----------------------------------------------------------------------------
def lstm_reference(x_tbh, w_ih, w_hh, b_ih, b_hh, h0, c0):
    def step(carry, x):
        h, c = carry
        g = x @ w_ih.T + b_ih + h @ w_hh.T + b_hh
        H = h.shape[-1]
        i = jax.nn.sigmoid(g[:, 0 * H:1 * H])
        f = jax.nn.sigmoid(g[:, 1 * H:2 * H])
        gg = jnp.tanh(g[:, 2 * H:3 * H])
        o = jax.nn.sigmoid(g[:, 3 * H:4 * H])
        c = f * c + i * gg
        h = o * jnp.tanh(c)
        return (h, c), h
    (h_n, c_n), outs = jax.lax.scan(step, (h0, c0), x_tbh)
    return outs, h_n, c_n


if __name__ == "__main__":
    B, T, H, VOCAB = 2, 8, 32, 16

    key = jax.random.PRNGKey(0)
    k_emb, k_wih, k_whh, k_bih, k_bhh, k_tok, k_h, k_c = jax.random.split(key, 8)

    emb_table = jax.random.normal(k_emb, (VOCAB, H), jnp.float32) * 0.1
    w_ih = jax.random.normal(k_wih, (4 * H, H), jnp.float32) * 0.1
    w_hh = jax.random.normal(k_whh, (4 * H, H), jnp.float32) * 0.1
    b_ih = jax.random.normal(k_bih, (4 * H,), jnp.float32) * 0.1
    b_hh = jax.random.normal(k_bhh, (4 * H,), jnp.float32) * 0.1
    params = (emb_table, w_ih, w_hh, b_ih, b_hh)

    tokens = jax.random.randint(k_tok, (B, T), 0, VOCAB, jnp.int32)
    h0 = jax.random.normal(k_h, (1, B, H), jnp.float32) * 0.1
    c0 = jax.random.normal(k_c, (1, B, H), jnp.float32) * 0.1
    encoder_state = (h0, c0)

    output, (h_n, c_n) = decoder_forward(params, tokens, encoder_state)
    jax.block_until_ready((output, h_n, c_n))

    # Sanity-check against a pure-JAX reference (reference is time-major).
    x_tbh = jnp.take(emb_table, jnp.transpose(tokens), axis=0)
    ref_out, ref_h, ref_c = lstm_reference(x_tbh, w_ih, w_hh, b_ih, b_hh,
                                           h0[0], c0[0])
    assert jnp.allclose(output, jnp.transpose(ref_out, (1, 0, 2)),
                        atol=1e-4, rtol=1e-4)
    assert jnp.allclose(h_n[0], ref_h, atol=1e-4, rtol=1e-4)
    assert jnp.allclose(c_n[0], ref_c, atol=1e-4, rtol=1e-4)

    print("KERNEL_OK")
</pallas_src>

<mosaic_0001>
module attributes {stable_mosaic.version = 11 : i64} {
  func.func @lstm_decoder_kernel(%arg0: i32, %arg1: memref<16x32xf32, #tpu.memory_space<vmem>>, %arg2: memref<32x128xf32, #tpu.memory_space<vmem>>, %arg3: memref<32x128xf32, #tpu.memory_space<vmem>>, %arg4: memref<1x128xf32, #tpu.memory_space<vmem>>, %arg5: memref<2x32xf32, #tpu.memory_space<vmem>>, %arg6: memref<2x32xf32, #tpu.memory_space<vmem>>, %arg7: memref<2x256xf32, #tpu.memory_space<vmem>>, %arg8: memref<2x32xf32, #tpu.memory_space<vmem>>, %arg9: memref<16x128xf32, #tpu.memory_space<vmem>>, %arg10: memref<2x32xf32, #tpu.memory_space<vmem>>, %arg11: memref<2x32xf32, #tpu.memory_space<vmem>>) attributes {dimension_semantics = [#tpu.dimension_semantics<arbitrary>], iteration_bounds = array<i64: 1>, scalar_prefetch = 0 : i64, scratch_operands = 3 : i64, tpu.core_type = #tpu.core_type<tc>, window_params = [{transform_indices = @transform_0, window_bounds = array<i64: 16, 32>}, {pipeline_mode = #tpu.pipeline_mode<synchronous>, transform_indices = @transform_1, window_bounds = array<i64: 32, 128>}, {pipeline_mode = #tpu.pipeline_mode<synchronous>, transform_indices = @transform_2, window_bounds = array<i64: 32, 128>}, {pipeline_mode = #tpu.pipeline_mode<synchronous>, transform_indices = @transform_3, window_bounds = array<i64: 1, 128>}, {pipeline_mode = #tpu.pipeline_mode<synchronous>, transform_indices = @transform_4, window_bounds = array<i64: 2, 32>}, {pipeline_mode = #tpu.pipeline_mode<synchronous>, transform_indices = @transform_5, window_bounds = array<i64: 2, 32>}, {transform_indices = @transform_6, window_bounds = array<i64: 2, 256>}, {pipeline_mode = #tpu.pipeline_mode<synchronous>, transform_indices = @transform_7, window_bounds = array<i64: 2, 32>}]} {
    %c0_i32 = arith.constant 0 : i32
    %0 = arith.cmpi eq, %arg0, %c0_i32 : i32
    %1 = arith.extui %0 : i1 to i32
    %c0_i32_0 = arith.constant 0 : i32
    %2 = arith.cmpi ne, %1, %c0_i32_0 : i32
    scf.if %2 {
      %c0_54 = arith.constant 0 : index
      %c0_55 = arith.constant 0 : index
      %178 = vector.load %arg5[%c0_54, %c0_55] : memref<2x32xf32, #tpu.memory_space<vmem>>, vector<2x32xf32>
      %c0_56 = arith.constant 0 : index
      %c0_57 = arith.constant 0 : index
      %179 = vector.load %arg10[%c0_56, %c0_57] : memref<2x32xf32, #tpu.memory_space<vmem>>, vector<2x32xf32>
      tpu.vector_store %arg10[%c0_56, %c0_57], %178 {strides = array<i32>} : memref<2x32xf32, #tpu.memory_space<vmem>>, vector<2x32xf32>,
      %c0_58 = arith.constant 0 : index
      %c0_59 = arith.constant 0 : index
      %180 = vector.load %arg6[%c0_58, %c0_59] : memref<2x32xf32, #tpu.memory_space<vmem>>, vector<2x32xf32>
      %c0_60 = arith.constant 0 : index
      %c0_61 = arith.constant 0 : index
      %181 = vector.load %arg11[%c0_60, %c0_61] : memref<2x32xf32, #tpu.memory_space<vmem>>, vector<2x32xf32>
      tpu.vector_store %arg11[%c0_60, %c0_61], %180 {strides = array<i32>} : memref<2x32xf32, #tpu.memory_space<vmem>>, vector<2x32xf32>,
    } else {
    }
    %c0 = arith.constant 0 : index
    %c0_1 = arith.constant 0 : index
    %3 = vector.load %arg1[%c0, %c0_1] : memref<16x32xf32, #tpu.memory_space<vmem>>, vector<16x32xf32>
    %c0_2 = arith.constant 0 : index
    %c0_3 = arith.constant 0 : index
    %4 = vector.load %arg2[%c0_2, %c0_3] : memref<32x128xf32, #tpu.memory_space<vmem>>, vector<32x128xf32>
    %cst = arith.constant dense<0.000000e+00> : vector<16x128xf32>
    %5 = tpu.matmul %3, %4, %cst {dimension_numbers = #tpu.dot_dimension_numbers<[1], [0], [0], [1], [0, 0, 1, 1], [], []>} : vector<16x32xf32>, vector<32x128xf32>, vector<16x128xf32> -> vector<16x128xf32>
    %c0_4 = arith.constant 0 : index
    %c0_5 = arith.constant 0 : index
    %6 = vector.load %arg4[%c0_4, %c0_5] : memref<1x128xf32, #tpu.memory_space<vmem>>, vector<1x128xf32>
    %7 = vector.broadcast %6 : vector<1x128xf32> to vector<16x128xf32>
    %8 = arith.addf %5, %7 : vector<16x128xf32>
    %c0_6 = arith.constant 0 : index
    %c0_7 = arith.constant 0 : index
    %9 = vector.load %arg9[%c0_6, %c0_7] : memref<16x128xf32, #tpu.memory_space<vmem>>, vector<16x128xf32>
    tpu.vector_store %arg9[%c0_6, %c0_7], %8 {strides = array<i32>} : memref<16x128xf32, #tpu.memory_space<vmem>>, vector<16x128xf32>,
    %c0_8 = arith.constant 0 : index
    %c0_9 = arith.constant 0 : index
    %10 = vector.load %arg10[%c0_8, %c0_9] : memref<2x32xf32, #tpu.memory_space<vmem>>, vector<2x32xf32>
    %c0_10 = arith.constant 0 : index
    %c0_11 = arith.constant 0 : index
    %11 = vector.load %arg11[%c0_10, %c0_11] : memref<2x32xf32, #tpu.memory_space<vmem>>, vector<2x32xf32>
    %c0_12 = arith.constant 0 : index
    %c0_13 = arith.constant 0 : index
    %12 = vector.load %arg3[%c0_12, %c0_13] : memref<32x128xf32, #tpu.memory_space<vmem>>, vector<32x128xf32>
    %c0_14 = arith.constant 0 : index
    %c0_15 = arith.constant 0 : index
    %13 = vector.load %arg9[%c0_14, %c0_15] : memref<16x128xf32, #tpu.memory_space<vmem>>, vector<2x128xf32>
    %cst_16 = arith.constant dense<0.000000e+00> : vector<2x128xf32>
    %14 = tpu.matmul %10, %12, %cst_16 {dimension_numbers = #tpu.dot_dimension_numbers<[1], [0], [0], [1], [0, 0, 1, 1], [], []>} : vector<2x32xf32>, vector<32x128xf32>, vector<2x128xf32> -> vector<2x128xf32>
    %15 = arith.addf %13, %14 : vector<2x128xf32>
    %16 = vector.extract_strided_slice %15 {offsets = [0, 0], sizes = [2, 96], strides = [1, 1]} : vector<2x128xf32> to vector<2x96xf32>
    %17 = arith.negf %16 : vector<2x96xf32>
    %18 = math.exp %17 : vector<2x96xf32>
    %cst_17 = arith.constant 1.000000e+00 : f32
    %19 = vector.broadcast %cst_17 : f32 to vector<2x96xf32>
    %20 = arith.addf %19, %18 : vector<2x96xf32>
    %21 = arith.divf %19, %20 : vector<2x96xf32>
    %22 = vector.extract_strided_slice %15 {offsets = [0, 96], sizes = [2, 32], strides = [1, 1]} : vector<2x128xf32> to vector<2x32xf32>
    %23 = math.tanh %22 : vector<2x32xf32>
    %24 = vector.extract_strided_slice %21 {offsets = [0, 32], sizes = [2, 32], strides = [1, 1]} : vector<2x96xf32> to vector<2x32xf32>
    %25 = arith.mulf %24, %11 : vector<2x32xf32>
    %26 = vector.extract_strided_slice %21 {offsets = [0, 0], sizes = [2, 32], strides = [1, 1]} : vector<2x96xf32> to vector<2x32xf32>
    %27 = arith.mulf %26, %23 : vector<2x32xf32>
    %28 = arith.addf %25, %27 : vector<2x32xf32>
    %29 = vector.extract_strided_slice %21 {offsets = [0, 64], sizes = [2, 32], strides = [1, 1]} : vector<2x96xf32> to vector<2x32xf32>
    %30 = math.tanh %28 : vector<2x32xf32>
    %31 = arith.mulf %29, %30 : vector<2x32xf32>
    %c0_18 = arith.constant 0 : index
    %c0_19 = arith.constant 0 : index
    %32 = vector.load %arg7[%c0_18, %c0_19] : memref<2x256xf32, #tpu.memory_space<vmem>>, vector<2x32xf32>
    tpu.vector_store %arg7[%c0_18, %c0_19], %31 {strides = array<i32>} : memref<2x256xf32, #tpu.memory_space<vmem>>, vector<2x32xf32>,
    %c2 = arith.constant 2 : index
    %c0_20 = arith.constant 0 : index
    %33 = vector.load %arg9[%c2, %c0_20] : memref<16x128xf32, #tpu.memory_space<vmem>>, vector<2x128xf32>
    %cst_21 = arith.constant dense<0.000000e+00> : vector<2x128xf32>
    %34 = tpu.matmul %31, %12, %cst_21 {dimension_numbers = #tpu.dot_dimension_numbers<[1], [0], [0], [1], [0, 0, 1, 1], [], []>} : vector<2x32xf32>, vector<32x128xf32>, vector<2x128xf32> -> vector<2x128xf32>
    %35 = arith.addf %33, %34 : vector<2x128xf32>
    %36 = vector.extract_strided_slice %35 {offsets = [0, 0], sizes = [2, 96], strides = [1, 1]} : vector<2x128xf32> to vector<2x96xf32>
    %37 = arith.negf %36 : vector<2x96xf32>
    %38 = math.exp %37 : vector<2x96xf32>
    %cst_22 = arith.constant 1.000000e+00 : f32
    %39 = vector.broadcast %cst_22 : f32 to vector<2x96xf32>
    %40 = arith.addf %39, %38 : vector<2x96xf32>
    %41 = arith.divf %39, %40 : vector<2x96xf32>
    %42 = vector.extract_strided_slice %35 {offsets = [0, 96], sizes = [2, 32], strides = [1, 1]} : vector<2x128xf32> to vector<2x32xf32>
    %43 = math.tanh %42 : vector<2x32xf32>
    %44 = vector.extract_strided_slice %41 {offsets = [0, 32], sizes = [2, 32], strides = [1, 1]} : vector<2x96xf32> to vector<2x32xf32>
    %45 = arith.mulf %44, %28 : vector<2x32xf32>
    %46 = vector.extract_strided_slice %41 {offsets = [0, 0], sizes = [2, 32], strides = [1, 1]} : vector<2x96xf32> to vector<2x32xf32>
    %47 = arith.mulf %46, %43 : vector<2x32xf32>
    %48 = arith.addf %45, %47 : vector<2x32xf32>
    %49 = vector.extract_strided_slice %41 {offsets = [0, 64], sizes = [2, 32], strides = [1, 1]} : vector<2x96xf32> to vector<2x32xf32>
    %50 = math.tanh %48 : vector<2x32xf32>
    %51 = arith.mulf %49, %50 : vector<2x32xf32>
    %c0_23 = arith.constant 0 : index
    %c32 = arith.constant 32 : index
    %52 = vector.load %arg7[%c0_23, %c32] : memref<2x256xf32, #tpu.memory_space<vmem>>, vector<2x32xf32>
    tpu.vector_store %arg7[%c0_23, %c32], %51 {strides = array<i32>} : memref<2x256xf32, #tpu.memory_space<vmem>>, vector<2x32xf32>,
    %c4 = arith.constant 4 : index
    %c0_24 = arith.constant 0 : index
    %53 = vector.load %arg9[%c4, %c0_24] : memref<16x128xf32, #tpu.memory_space<vmem>>, vector<2x128xf32>
    %cst_25 = arith.constant dense<0.000000e+00> : vector<2x128xf32>
    %54 = tpu.matmul %51, %12, %cst_25 {dimension_numbers = #tpu.dot_dimension_numbers<[1], [0], [0], [1], [0, 0, 1, 1], [], []>} : vector<2x32xf32>, vector<32x128xf32>, vector<2x128xf32> -> vector<2x128xf32>
    %55 = arith.addf %53, %54 : vector<2x128xf32>
    %56 = vector.extract_strided_slice %55 {offsets = [0, 0], sizes = [2, 96], strides = [1, 1]} : vector<2x128xf32> to vector<2x96xf32>
    %57 = arith.negf %56 : vector<2x96xf32>
    %58 = math.exp %57 : vector<2x96xf32>
    %cst_26 = arith.constant 1.000000e+00 : f32
    %59 = vector.broadcast %cst_26 : f32 to vector<2x96xf32>
    %60 = arith.addf %59, %58 : vector<2x96xf32>
    %61 = arith.divf %59, %60 : vector<2x96xf32>
    %62 = vector.extract_strided_slice %55 {offsets = [0, 96], sizes = [2, 32], strides = [1, 1]} : vector<2x128xf32> to vector<2x32xf32>
    %63 = math.tanh %62 : vector<2x32xf32>
    %64 = vector.extract_strided_slice %61 {offsets = [0, 32], sizes = [2, 32], strides = [1, 1]} : vector<2x96xf32> to vector<2x32xf32>
    %65 = arith.mulf %64, %48 : vector<2x32xf32>
    %66 = vector.extract_strided_slice %61 {offsets = [0, 0], sizes = [2, 32], strides = [1, 1]} : vector<2x96xf32> to vector<2x32xf32>
    %67 = arith.mulf %66, %63 : vector<2x32xf32>
    %68 = arith.addf %65, %67 : vector<2x32xf32>
    %69 = vector.extract_strided_slice %61 {offsets = [0, 64], sizes = [2, 32], strides = [1, 1]} : vector<2x96xf32> to vector<2x32xf32>
    %70 = math.tanh %68 : vector<2x32xf32>
    %71 = arith.mulf %69, %70 : vector<2x32xf32>
    %c0_27 = arith.constant 0 : index
    %c64 = arith.constant 64 : index
    %72 = vector.load %arg7[%c0_27, %c64] : memref<2x256xf32, #tpu.memory_space<vmem>>, vector<2x32xf32>
    tpu.vector_store %arg7[%c0_27, %c64], %71 {strides = array<i32>} : memref<2x256xf32, #tpu.memory_space<vmem>>, vector<2x32xf32>,
    %c6 = arith.constant 6 : index
    %c0_28 = arith.constant 0 : index
    %73 = vector.load %arg9[%c6, %c0_28] : memref<16x128xf32, #tpu.memory_space<vmem>>, vector<2x128xf32>
    %cst_29 = arith.constant dense<0.000000e+00> : vector<2x128xf32>
    %74 = tpu.matmul %71, %12, %cst_29 {dimension_numbers = #tpu.dot_dimension_numbers<[1], [0], [0], [1], [0, 0, 1, 1], [], []>} : vector<2x32xf32>, vector<32x128xf32>, vector<2x128xf32> -> vector<2x128xf32>
    %75 = arith.addf %73, %74 : vector<2x128xf32>
    %76 = vector.extract_strided_slice %75 {offsets = [0, 0], sizes = [2, 96], strides = [1, 1]} : vector<2x128xf32> to vector<2x96xf32>
    %77 = arith.negf %76 : vector<2x96xf32>
    %78 = math.exp %77 : vector<2x96xf32>
    %cst_30 = arith.constant 1.000000e+00 : f32
    %79 = vector.broadcast %cst_30 : f32 to vector<2x96xf32>
    %80 = arith.addf %79, %78 : vector<2x96xf32>
    %81 = arith.divf %79, %80 : vector<2x96xf32>
    %82 = vector.extract_strided_slice %75 {offsets = [0, 96], sizes = [2, 32], strides = [1, 1]} : vector<2x128xf32> to vector<2x32xf32>
    %83 = math.tanh %82 : vector<2x32xf32>
    %84 = vector.extract_strided_slice %81 {offsets = [0, 32], sizes = [2, 32], strides = [1, 1]} : vector<2x96xf32> to vector<2x32xf32>
    %85 = arith.mulf %84, %68 : vector<2x32xf32>
    %86 = vector.extract_strided_slice %81 {offsets = [0, 0], sizes = [2, 32], strides = [1, 1]} : vector<2x96xf32> to vector<2x32xf32>
    %87 = arith.mulf %86, %83 : vector<2x32xf32>
    %88 = arith.addf %85, %87 : vector<2x32xf32>
    %89 = vector.extract_strided_slice %81 {offsets = [0, 64], sizes = [2, 32], strides = [1, 1]} : vector<2x96xf32> to vector<2x32xf32>
    %90 = math.tanh %88 : vector<2x32xf32>
    %91 = arith.mulf %89, %90 : vector<2x32xf32>
    %c0_31 = arith.constant 0 : index
    %c96 = arith.constant 96 : index
    %92 = vector.load %arg7[%c0_31, %c96] : memref<2x256xf32, #tpu.memory_space<vmem>>, vector<2x32xf32>
    tpu.vector_store %arg7[%c0_31, %c96], %91 {strides = array<i32>} : memref<2x256xf32, #tpu.memory_space<vmem>>, vector<2x32xf32>,
    %c8 = arith.constant 8 : index
    %c0_32 = arith.constant 0 : index
    %93 = vector.load %arg9[%c8, %c0_32] : memref<16x128xf32, #tpu.memory_space<vmem>>, vector<2x128xf32>
    %cst_33 = arith.constant dense<0.000000e+00> : vector<2x128xf32>
    %94 = tpu.matmul %91, %12, %cst_33 {dimension_numbers = #tpu.dot_dimension_numbers<[1], [0], [0], [1], [0, 0, 1, 1], [], []>} : vector<2x32xf32>, vector<32x128xf32>, vector<2x128xf32> -> vector<2x128xf32>
    %95 = arith.addf %93, %94 : vector<2x128xf32>
    %96 = vector.extract_strided_slice %95 {offsets = [0, 0], sizes = [2, 96], strides = [1, 1]} : vector<2x128xf32> to vector<2x96xf32>
    %97 = arith.negf %96 : vector<2x96xf32>
    %98 = math.exp %97 : vector<2x96xf32>
    %cst_34 = arith.constant 1.000000e+00 : f32
    %99 = vector.broadcast %cst_34 : f32 to vector<2x96xf32>
    %100 = arith.addf %99, %98 : vector<2x96xf32>
    %101 = arith.divf %99, %100 : vector<2x96xf32>
    %102 = vector.extract_strided_slice %95 {offsets = [0, 96], sizes = [2, 32], strides = [1, 1]} : vector<2x128xf32> to vector<2x32xf32>
    %103 = math.tanh %102 : vector<2x32xf32>
    %104 = vector.extract_strided_slice %101 {offsets = [0, 32], sizes = [2, 32], strides = [1, 1]} : vector<2x96xf32> to vector<2x32xf32>
    %105 = arith.mulf %104, %88 : vector<2x32xf32>
    %106 = vector.extract_strided_slice %101 {offsets = [0, 0], sizes = [2, 32], strides = [1, 1]} : vector<2x96xf32> to vector<2x32xf32>
    %107 = arith.mulf %106, %103 : vector<2x32xf32>
    %108 = arith.addf %105, %107 : vector<2x32xf32>
    %109 = vector.extract_strided_slice %101 {offsets = [0, 64], sizes = [2, 32], strides = [1, 1]} : vector<2x96xf32> to vector<2x32xf32>
    %110 = math.tanh %108 : vector<2x32xf32>
    %111 = arith.mulf %109, %110 : vector<2x32xf32>
    %c0_35 = arith.constant 0 : index
    %c128 = arith.constant 128 : index
    %112 = vector.load %arg7[%c0_35, %c128] : memref<2x256xf32, #tpu.memory_space<vmem>>, vector<2x32xf32>
    tpu.vector_store %arg7[%c0_35, %c128], %111 {strides = array<i32>} : memref<2x256xf32, #tpu.memory_space<vmem>>, vector<2x32xf32>,
    %c10 = arith.constant 10 : index
    %c0_36 = arith.constant 0 : index
    %113 = vector.load %arg9[%c10, %c0_36] : memref<16x128xf32, #tpu.memory_space<vmem>>, vector<2x128xf32>
    %cst_37 = arith.constant dense<0.000000e+00> : vector<2x128xf32>
    %114 = tpu.matmul %111, %12, %cst_37 {dimension_numbers = #tpu.dot_dimension_numbers<[1], [0], [0], [1], [0, 0, 1, 1], [], []>} : vector<2x32xf32>, vector<32x128xf32>, vector<2x128xf32> -> vector<2x128xf32>
    %115 = arith.addf %113, %114 : vector<2x128xf32>
    %116 = vector.extract_strided_slice %115 {offsets = [0, 0], sizes = [2, 96], strides = [1, 1]} : vector<2x128xf32> to vector<2x96xf32>
    %117 = arith.negf %116 : vector<2x96xf32>
    %118 = math.exp %117 : vector<2x96xf32>
    %cst_38 = arith.constant 1.000000e+00 : f32
    %119 = vector.broadcast %cst_38 : f32 to vector<2x96xf32>
    %120 = arith.addf %119, %118 : vector<2x96xf32>
    %121 = arith.divf %119, %120 : vector<2x96xf32>
    %122 = vector.extract_strided_slice %115 {offsets = [0, 96], sizes = [2, 32], strides = [1, 1]} : vector<2x128xf32> to vector<2x32xf32>
    %123 = math.tanh %122 : vector<2x32xf32>
    %124 = vector.extract_strided_slice %121 {offsets = [0, 32], sizes = [2, 32], strides = [1, 1]} : vector<2x96xf32> to vector<2x32xf32>
    %125 = arith.mulf %124, %108 : vector<2x32xf32>
    %126 = vector.extract_strided_slice %121 {offsets = [0, 0], sizes = [2, 32], strides = [1, 1]} : vector<2x96xf32> to vector<2x32xf32>
    %127 = arith.mulf %126, %123 : vector<2x32xf32>
    %128 = arith.addf %125, %127 : vector<2x32xf32>
    %129 = vector.extract_strided_slice %121 {offsets = [0, 64], sizes = [2, 32], strides = [1, 1]} : vector<2x96xf32> to vector<2x32xf32>
    %130 = math.tanh %128 : vector<2x32xf32>
    %131 = arith.mulf %129, %130 : vector<2x32xf32>
    %c0_39 = arith.constant 0 : index
    %c160 = arith.constant 160 : index
    %132 = vector.load %arg7[%c0_39, %c160] : memref<2x256xf32, #tpu.memory_space<vmem>>, vector<2x32xf32>
    tpu.vector_store %arg7[%c0_39, %c160], %131 {strides = array<i32>} : memref<2x256xf32, #tpu.memory_space<vmem>>, vector<2x32xf32>,
    %c12 = arith.constant 12 : index
    %c0_40 = arith.constant 0 : index
    %133 = vector.load %arg9[%c12, %c0_40] : memref<16x128xf32, #tpu.memory_space<vmem>>, vector<2x128xf32>
    %cst_41 = arith.constant dense<0.000000e+00> : vector<2x128xf32>
    %134 = tpu.matmul %131, %12, %cst_41 {dimension_numbers = #tpu.dot_dimension_numbers<[1], [0], [0], [1], [0, 0, 1, 1], [], []>} : vector<2x32xf32>, vector<32x128xf32>, vector<2x128xf32> -> vector<2x128xf32>
    %135 = arith.addf %133, %134 : vector<2x128xf32>
    %136 = vector.extract_strided_slice %135 {offsets = [0, 0], sizes = [2, 96], strides = [1, 1]} : vector<2x128xf32> to vector<2x96xf32>
    %137 = arith.negf %136 : vector<2x96xf32>
    %138 = math.exp %137 : vector<2x96xf32>
    %cst_42 = arith.constant 1.000000e+00 : f32
    %139 = vector.broadcast %cst_42 : f32 to vector<2x96xf32>
    %140 = arith.addf %139, %138 : vector<2x96xf32>
    %141 = arith.divf %139, %140 : vector<2x96xf32>
    %142 = vector.extract_strided_slice %135 {offsets = [0, 96], sizes = [2, 32], strides = [1, 1]} : vector<2x128xf32> to vector<2x32xf32>
    %143 = math.tanh %142 : vector<2x32xf32>
    %144 = vector.extract_strided_slice %141 {offsets = [0, 32], sizes = [2, 32], strides = [1, 1]} : vector<2x96xf32> to vector<2x32xf32>
    %145 = arith.mulf %144, %128 : vector<2x32xf32>
    %146 = vector.extract_strided_slice %141 {offsets = [0, 0], sizes = [2, 32], strides = [1, 1]} : vector<2x96xf32> to vector<2x32xf32>
    %147 = arith.mulf %146, %143 : vector<2x32xf32>
    %148 = arith.addf %145, %147 : vector<2x32xf32>
    %149 = vector.extract_strided_slice %141 {offsets = [0, 64], sizes = [2, 32], strides = [1, 1]} : vector<2x96xf32> to vector<2x32xf32>
    %150 = math.tanh %148 : vector<2x32xf32>
    %151 = arith.mulf %149, %150 : vector<2x32xf32>
    %c0_43 = arith.constant 0 : index
    %c192 = arith.constant 192 : index
    %152 = vector.load %arg7[%c0_43, %c192] : memref<2x256xf32, #tpu.memory_space<vmem>>, vector<2x32xf32>
    tpu.vector_store %arg7[%c0_43, %c192], %151 {strides = array<i32>} : memref<2x256xf32, #tpu.memory_space<vmem>>, vector<2x32xf32>,
    %c14 = arith.constant 14 : index
    %c0_44 = arith.constant 0 : index
    %153 = vector.load %arg9[%c14, %c0_44] : memref<16x128xf32, #tpu.memory_space<vmem>>, vector<2x128xf32>
    %cst_45 = arith.constant dense<0.000000e+00> : vector<2x128xf32>
    %154 = tpu.matmul %151, %12, %cst_45 {dimension_numbers = #tpu.dot_dimension_numbers<[1], [0], [0], [1], [0, 0, 1, 1], [], []>} : vector<2x32xf32>, vector<32x128xf32>, vector<2x128xf32> -> vector<2x128xf32>
    %155 = arith.addf %153, %154 : vector<2x128xf32>
    %156 = vector.extract_strided_slice %155 {offsets = [0, 0], sizes = [2, 96], strides = [1, 1]} : vector<2x128xf32> to vector<2x96xf32>
    %157 = arith.negf %156 : vector<2x96xf32>
    %158 = math.exp %157 : vector<2x96xf32>
    %cst_46 = arith.constant 1.000000e+00 : f32
    %159 = vector.broadcast %cst_46 : f32 to vector<2x96xf32>
    %160 = arith.addf %159, %158 : vector<2x96xf32>
    %161 = arith.divf %159, %160 : vector<2x96xf32>
    %162 = vector.extract_strided_slice %155 {offsets = [0, 96], sizes = [2, 32], strides = [1, 1]} : vector<2x128xf32> to vector<2x32xf32>
    %163 = math.tanh %162 : vector<2x32xf32>
    %164 = vector.extract_strided_slice %161 {offsets = [0, 32], sizes = [2, 32], strides = [1, 1]} : vector<2x96xf32> to vector<2x32xf32>
    %165 = arith.mulf %164, %148 : vector<2x32xf32>
    %166 = vector.extract_strided_slice %161 {offsets = [0, 0], sizes = [2, 32], strides = [1, 1]} : vector<2x96xf32> to vector<2x32xf32>
    %167 = arith.mulf %166, %163 : vector<2x32xf32>
    %168 = arith.addf %165, %167 : vector<2x32xf32>
    %169 = vector.extract_strided_slice %161 {offsets = [0, 64], sizes = [2, 32], strides = [1, 1]} : vector<2x96xf32> to vector<2x32xf32>
    %170 = math.tanh %168 : vector<2x32xf32>
    %171 = arith.mulf %169, %170 : vector<2x32xf32>
    %c0_47 = arith.constant 0 : index
    %c224 = arith.constant 224 : index
    %172 = vector.load %arg7[%c0_47, %c224] : memref<2x256xf32, #tpu.memory_space<vmem>>, vector<2x32xf32>
    tpu.vector_store %arg7[%c0_47, %c224], %171 {strides = array<i32>} : memref<2x256xf32, #tpu.memory_space<vmem>>, vector<2x32xf32>,
    %c0_48 = arith.constant 0 : index
    %c0_49 = arith.constant 0 : index
    %173 = vector.load %arg10[%c0_48, %c0_49] : memref<2x32xf32, #tpu.memory_space<vmem>>, vector<2x32xf32>
    tpu.vector_store %arg10[%c0_48, %c0_49], %171 {strides = array<i32>} : memref<2x32xf32, #tpu.memory_space<vmem>>, vector<2x32xf32>,
    %c0_50 = arith.constant 0 : index
    %c0_51 = arith.constant 0 : index
    %174 = vector.load %arg11[%c0_50, %c0_51] : memref<2x32xf32, #tpu.memory_space<vmem>>, vector<2x32xf32>
    tpu.vector_store %arg11[%c0_50, %c0_51], %168 {strides = array<i32>} : memref<2x32xf32, #tpu.memory_space<vmem>>, vector<2x32xf32>,
    %c0_i32_52 = arith.constant 0 : i32
    %175 = arith.cmpi eq, %arg0, %c0_i32_52 : i32
    %176 = arith.extui %175 : i1 to i32
    %c0_i32_53 = arith.constant 0 : i32
    %177 = arith.cmpi ne, %176, %c0_i32_53 : i32
    scf.if %177 {
      %c0_54 = arith.constant 0 : index
      %c0_55 = arith.constant 0 : index
      %178 = vector.load %arg8[%c0_54, %c0_55] : memref<2x32xf32, #tpu.memory_space<vmem>>, vector<2x32xf32>
      tpu.vector_store %arg8[%c0_54, %c0_55], %168 {strides = array<i32>} : memref<2x32xf32, #tpu.memory_space<vmem>>, vector<2x32xf32>,
    } else {
    }
    return
  }
  func.func @transform_0(%arg0: i32) -> (i32, i32) {
    %c0_i32 = arith.constant 0 : i32
    %c0_i32_0 = arith.constant 0 : i32
    return %arg0, %c0_i32 : i32, i32
  }
  func.func @transform_1(%arg0: i32) -> (i32, i32) {
    %c0_i32 = arith.constant 0 : i32
    %c0_i32_0 = arith.constant 0 : i32
    %c0_i32_1 = arith.constant 0 : i32
    return %c0_i32, %c0_i32_0 : i32, i32
  }
  func.func @transform_2(%arg0: i32) -> (i32, i32) {
    %c0_i32 = arith.constant 0 : i32
    %c0_i32_0 = arith.constant 0 : i32
    %c0_i32_1 = arith.constant 0 : i32
    return %c0_i32, %c0_i32_0 : i32, i32
  }
  func.func @transform_3(%arg0: i32) -> (i32, i32) {
    %c0_i32 = arith.constant 0 : i32
    %c0_i32_0 = arith.constant 0 : i32
    %c0_i32_1 = arith.constant 0 : i32
    return %c0_i32, %c0_i32_0 : i32, i32
  }
  func.func @transform_4(%arg0: i32) -> (i32, i32) {
    %c0_i32 = arith.constant 0 : i32
    %c0_i32_0 = arith.constant 0 : i32
    %c0_i32_1 = arith.constant 0 : i32
    return %c0_i32, %c0_i32_0 : i32, i32
  }
  func.func @transform_5(%arg0: i32) -> (i32, i32) {
    %c0_i32 = arith.constant 0 : i32
    %c0_i32_0 = arith.constant 0 : i32
    %c0_i32_1 = arith.constant 0 : i32
    return %c0_i32, %c0_i32_0 : i32, i32
  }
  func.func @transform_6(%arg0: i32) -> (i32, i32) {
    %c0_i32 = arith.constant 0 : i32
    %c0_i32_0 = arith.constant 0 : i32
    return %c0_i32, %arg0 : i32, i32
  }
  func.func @transform_7(%arg0: i32) -> (i32, i32) {
    %c0_i32 = arith.constant 0 : i32
    %c0_i32_0 = arith.constant 0 : i32
    %c0_i32_1 = arith.constant 0 : i32
    return %c0_i32, %c0_i32_0 : i32, i32
  }
}

</mosaic_0001>

<bundles_post_ra>
// kernel: tpu_custom_call.1
= control target key start
LH: loop header
LB: loop body
LE: loop exit
PB: predicated region body
PF: predicated region fallthrough
CT: control target
= control target key end

     0   :  { %13 = vsyncpa [#allocation6], 0  ;;  %s1801_s0 = inlined_call_operand.hbm [shape: f32[16,32], index: 0, kind: input, shape index: {}]   ;;  %s1802_s1 = inlined_call_operand.hbm [shape: f32[32,128], index: 1, kind: input, shape index: {}]   ;;  %s1803_s2 = inlined_call_operand.hbm [shape: f32[32,128], index: 2, kind: input, shape index: {}]   ;;  %s1804_s3 = inlined_call_operand.vmem [shape: f32[1,128], index: 3, kind: input, shape index: {}]   ;;  %s1805_s4 = inlined_call_operand.vmem [shape: f32[2,32], index: 4, kind: input, shape index: {}]   ;;  %s1806_s5 = inlined_call_operand.vmem [shape: f32[2,32], index: 5, kind: input, shape index: {}]   ;;  %s1807_s6 = inlined_call_operand.hbm [shape: f32[2,256], index: 6, kind: output, shape index: {0}]   ;;  %s1808_s7 = inlined_call_operand.hbm [shape: f32[2,32], index: 7, kind: output, shape index: {1}]  }
   0x1   :  { %14 = vsyncpa [#allocation9], 0 }
   0x2   :  { %15 = vsyncpa [#allocation7], 0 }
   0x3   :  { %16 = vsyncpa [#allocation13], 0  ;;  %s1522_s24 = smov [#allocation8]   ;;  %s1523_s26 = smov [#allocation5]  }
   0x4   :  { %s34_s25 = sshll.u32 %s1522_s24, 4  ;;  %s22_s27 = sshll.u32 %s1523_s26, 4  ;;  %s35_s25 = int_to_ptr.vmem [resolvable:$true] %s34_s25  ;;  %s1576_s27 = int_to_ptr.vmem [resolvable:$true] %s22_s27 }
   0x5   :  { %s1404_s30 = scalar_lea.hbm %s1802_s1, 512 }
   0x6   :  { %p1405_p0 = scmp.ne.s32.totalorder %s1802_s1, %s1404_s30  ;;  %p1408_p1 = scmp.lt.u32.totalorder %s1404_s30, %s1802_s1 }
   0x8   :  { %p1410_p2 = pnand %p1408_p1, %p1405_p0 }
   0xa   :  { %1413 = shalt.err (!%p1410_p2)
}
   0xb   :  { %s1414_s12 = scalar_lea.vmem %s35_s25, 512  ;;  %p1419_p4 = scmp.lt.s32.totalorder %s35_s25, %s35_s25 }
   0xc   :  { %p1415_p3 = scmp.ne.s32.totalorder %s35_s25, %s1414_s12  ;;  %p1420_p5 = scmp.lt.s32.totalorder %s1414_s12, %s1414_s12 }
   0xe   :  { %p1421_p6 = por %p1420_p5, %p1419_p4 }
  0x10   :  { %p1422_p7 = pnand %p1421_p6, %p1415_p3 }
  0x12   :  { %1425 = shalt.err (!%p1422_p7)
}
  0x13   :  { %s1524_s13 = smov 128   ;;  %s1525_s14 = smov 8  }
  0x14   :  { %40 = dma.hbm_to_vmem [thread:$0]  %s1802_s1, 512, %s35_s25, [#allocation9], %s1524_s13, %s1524_s13, %s1525_s14  }
  0x15   :  { %s1426_s19 = scalar_lea.hbm %s1801_s0, 256 }
  0x16   :  { %p1427_p8 = scmp.ne.s32.totalorder %s1801_s0, %s1426_s19  ;;  %p1430_p9 = scmp.lt.u32.totalorder %s1426_s19, %s1801_s0 }
  0x18   :  { %p1432_p10 = pnand %p1430_p9, %p1427_p8 }
  0x1a   :  { %1435 = shalt.err (!%p1432_p10)
}
  0x1b   :  { %s1436_s24 = scalar_lea.vmem %s1576_s27, 256  ;;  %p1441_p12 = scmp.lt.s32.totalorder %s1576_s27, %s1576_s27 }
  0x1c   :  { %p1437_p11 = scmp.ne.s32.totalorder %s1576_s27, %s1436_s24  ;;  %p1442_p13 = scmp.lt.s32.totalorder %s1436_s24, %s1436_s24 }
  0x1e   :  { %p1443_p0 = por %p1442_p13, %p1441_p12 }
  0x20   :  { %p1444_p1 = pnand %p1443_p0, %p1437_p11 }
  0x22   :  { %1447 = shalt.err (!%p1444_p1)
}
  0x23   :  { %28 = dma.hbm_to_vmem [thread:$0]  %s1801_s0, 256, %s1576_s27, [#allocation6], %s1524_s13, %s1524_s13, %s1525_s14  }
  0x24   :  { %s1526_s26 = smov [#allocation10]   ;;  %s1448_s8 = scalar_lea.hbm %s1803_s2, 512 }
  0x25   :  { %s46_s28 = sshll.u32 %s1526_s26, 4  ;;  %p1449_p2 = scmp.ne.s32.totalorder %s1803_s2, %s1448_s8  ;;  %s47_s28 = int_to_ptr.vmem [resolvable:$true] %s46_s28 }
  0x26   :  { %p1452_p3 = scmp.lt.u32.totalorder %s1448_s8, %s1803_s2 }
  0x28   :  { %p1454_p4 = pnand %p1452_p3, %p1449_p2 }
  0x2a   :  { %1457 = shalt.err (!%p1454_p4)
}
  0x2b   :  { %s1458_s15 = scalar_lea.vmem %s47_s28, 512  ;;  %p1463_p6 = scmp.lt.s32.totalorder %s47_s28, %s47_s28 }
  0x2c   :  { %p1459_p5 = scmp.ne.s32.totalorder %s47_s28, %s1458_s15  ;;  %p1464_p7 = scmp.lt.s32.totalorder %s1458_s15, %s1458_s15 }
  0x2e   :  { %p1465_p8 = por %p1464_p7, %p1463_p6 }
  0x30   :  { %p1466_p9 = pnand %p1465_p8, %p1459_p5 }
  0x32   :  { %1469 = shalt.err (!%p1466_p9)
}
  0x33   :  { %52 = dma.hbm_to_vmem [thread:$0]  %s1803_s2, 512, %s47_s28, [#allocation9], %s1524_s13, %s1524_s13, %s1525_s14  }
  0x34   :  { %1514 = dma.done.wait [#allocation6], 256  }
  0x35   :  { %1515 = vsyncadd [#allocation6], 4294967040 }
  0x36   :  { %1516 = dma.done.wait [#allocation9], 1024  }
  0x37   :  { %1517 = vsyncadd [#allocation9], 4294966272  ;;  %v1527_v0 = vmov 0.0|0.0   ;;  %vm1528_vm0 = vmmov 0   ;;  %v1529_v1 = vmov 0.0   ;;  %vm90_vm1 = vcmask 261120  }
  0x38   :  { %1278 = vmatprep.subr.bf16.mxu1 %v1527_v0  ;;  %1190 = vmatprep.mubr.msk.f32.mxu1 %vm1528_vm0, %v1529_v1  ;;  %v79_v2 = vld [vmem:[#allocation8] sm:$0xff]  ;;  %v80_v3 = vld [vmem:[#allocation8 + $0x8] sm:$0xff]  ;;  %v81_v4 = vld [vmem:[#allocation8 + $0x10] sm:$0xff]  ;;  %vm73_vm2 = vcmask 254976   ;;  %s1530_s18 = smov 32   ;;  %vm407_vm3 = vcmask 517376  }
  0x39   :  { %v1270_v5 = vpack.c.bf16 %v80_v3, %v79_v2  ;;  %v82_v6 = vld [vmem:[#allocation8 + $0x18] sm:$0xff]  ;;  %v77_v7 = vld [vmem:[#allocation5] sm:$0xff]  ;;  %v176_v9 = vld [vmem:[#allocation10] sm:$0xff]  ;;  %vm509_vm4 = vcmask 779776   ;;  %vm623_vm5 = vcmask 1042176   ;;  %s1534_s19 = smov [#allocation12]  }
  0x3a   :  { %v1274_v8 = vpack.c.bf16 %v82_v6, %v81_v4  ;;  %1179 = vmatprep.mubr.msk.f32.mxu0 %vm90_vm1, %v77_v7  ;;  %v177_v10 = vld [vmem:[#allocation10 + $0x8] sm:$0xff]  ;;  %v178_v11 = vld [vmem:[#allocation10 + $0x10] sm:$0xff]  ;;  %v179_v13 = vld [vmem:[#allocation10 + $0x18] sm:$0xff]  ;;  %s1092_s20 = sshll.u32 %s1534_s19, 4  ;;  %s1093_s20 = int_to_ptr.vmem [resolvable:$true] %s1092_s20 }
  0x3b   :  { %1271 = vmatprep.subr.bf16.mxu0 %v1270_v5  ;;  %v1632_v12 = vpack.c.bf16 %v177_v10, %v176_v9  ;;  %v72_v14 = vld [vmem:[%s1805_s4] sm:$0x3]  ;;  %v1639_v15 = vpack.c.bf16 %v179_v13, %v178_v11  ;;  %s1470_s21 = scalar_lea.vmem %s1093_s20, 32  ;;  %p1475_p11 = scmp.lt.s32.totalorder %s1093_s20, %s1093_s20 }
  0x3c   :  { %1273 = vmatpush3.bf16.msra.mxu0 %v1270_v5  ;;  %74 = vst.msk [vmem:[#allocation3] sm:$0x3] %vm73_vm2, %v72_v14  ;;  %v78_v16 = vld [vmem:[#allocation5 + $0x8] sm:$0xff]  ;;  %p1471_p10 = scmp.ne.s32.totalorder %s1093_s20, %s1470_s21  ;;  %p1476_p12 = scmp.lt.s32.totalorder %s1470_s21, %s1470_s21 }
  0x3d   :  { %1275 = vmatprep.subr.bf16.mxu0 %v1274_v8  ;;  %1280 = vmatpush3.bf16.msra.mxu1 %v1632_v12  ;;  %v75_v18 = vld [vmem:[%s1806_s5] sm:$0x3]  ;;  %s1533_s5 = smov 96  }
  0x3e   :  { %1281 = vmatprep.subr.bf16.mxu1 %v1527_v0  ;;  %76 = vst.msk [vmem:[#allocation4] sm:$0x3] %vm73_vm2, %v75_v18  ;;  %v1106_v19 = vld [vmem:[%s1804_s3] ss:$0 sm:$0xff]  ;;  %s1531_s3 = smov 64   ;;  %p1477_p13 = por %p1476_p12, %p1475_p11 }
  0x40   :  { %1277 = vmatpush3.bf16.msra.mxu0 %v1274_v8  ;;  %p1478_p0 = pnand %p1477_p13, %p1471_p10 }
  0x41   :  { %1283 = vmatpush3.bf16.msra.mxu1 %v1639_v15  ;;  %1284 = vmatprep.subr.bf16.mxu0 %v1527_v0 }
  0x42   :  { %1290 = vmatprep.subr.bf16.mxu1 %v1527_v0 }
  0x43   :  { %1180 = vmatmul.mubr.msk.f32.vlgmr.msra.gmra.mrb[0].mxu0 %vm90_vm1, %v78_v16  ;;  %v174_v17 = vld [vmem:[#allocation3] sm:$0x3] }
  0x44   :  { %1191 = vmatmul.mubr.msk.f32.vlgmr.msra.gmra.mrb[0].mxu1 %vm90_vm1, %v174_v17  ;;  %1286 = vmatpush3.bf16.msra.mxu0 %v1632_v12 }
  0x45   :  { %1287 = vmatprep.subr.bf16.mxu0 %v1527_v0  ;;  %1201 = vmatprep.mubr.msk.f32.mxu0 %vm1528_vm0, %v1529_v1  ;;  %v175_v29 = vld [vmem:[#allocation4] sm:$0x3] }
  0x46   :  { %1292 = vmatpush3.bf16.msra.mxu1 %v1632_v12  ;;  %1212 = vmatprep.mubr.msk.f32.mxu1 %vm1528_vm0, %v1529_v1 }
  0x47   :  { %1293 = vmatprep.subr.bf16.mxu1 %v1527_v0 }
  0x48   :  { %1289 = vmatpush3.bf16.msra.mxu0 %v1639_v15 }
  0x49   :  { %1296 = vmatprep.subr.bf16.mxu0 %v1527_v0 }
  0x4a   :  { %1295 = vmatpush3.bf16.msra.mxu1 %v1639_v15 }
  0x4b   :  { %1302 = vmatprep.subr.bf16.mxu1 %v1527_v0 }
 0x116   :  { %v1181_v20 = vpop.f32.mrb[0].mxu0 }
 0x117   :  { %v169_v21 = vadd.f32 %v1181_v20, %v1106_v19  ;;  %v163_v22 = vpop.f32.mrb[1].mxu0  ;;  %v250_v23 = vpop.f32.mrb[0].mxu1 }
 0x118   :  { %v164_v24 = vadd.f32 %v1106_v19, %v163_v22  ;;  %v1192_v25 = vpop.f32.mrb[1].mxu1 }
 0x119   :  { %173 = vst [vmem:[#allocation2 + $0x8] sm:$0xff] %v169_v21 }
 0x11a   :  { %172 = vst [vmem:[#allocation2] sm:$0xff] %v164_v24 }
 0x121   :  { %v180_v26 = vld [vmem:[#allocation2] sm:$0x3]  ;;  %v296_v44 = vld [vmem:[#allocation2 + $0x2] sm:$0x3]  ;;  %v409_v62 = vld [vmem:[#allocation2 + $0x4] sm:$0x3] }
 0x122   :  { %v254_v27 = vadd.f32 %v250_v23, %v180_v26  ;;  %v511_v20 = vld [vmem:[#allocation2 + $0x6] sm:$0x3] }
 0x124   :  { %1340 = vtanh.f32 %v254_v27  ;;  %v1110_v30 = vmul.f32 -1.442695, %v254_v27 }
 0x126   :  { %1342 = vpow2.f32 %v1110_v30 }
 0x12e   :  { %v1341_v28 = vpop.eup %1340 }
 0x12f   :  { %268 = vrot.lane.b32.xlu0 %v1341_v28, %s1530_s18 }
 0x130   :  { %v1343_v31 = vpop.eup %1342 }
 0x131   :  { %v258_v32 = vadd.f32 1.0, %v1343_v31 }
 0x133   :  { %263 = vrot.lane.b32.xlu0 %v175_v29, %s1530_s18  ;;  %1344 = vrcp.f32 %v258_v32 }
 0x13d   :  { %v1345_v33 = vpop.eup %1344 }
 0x1a1   :  { %v269_v34 = vpop.permute.xlu0 %268 }
 0x1a2   :  { %v271_v35 = vmul.f32 %v1345_v33, %v269_v34 }
 0x1a4   :  { %273 = vrot.lane.b32.xlu1 %v271_v35, %s1530_s18 }
 0x1a5   :  { %v264_v36 = vpop.permute.xlu0 %263 }
 0x1a6   :  { %v266_v37 = vmul.f32 %v1345_v33, %v264_v36 }
 0x216   :  { %v274_v38 = vpop.permute.xlu1 %273 }
 0x217   :  { %v276_v39 = vadd.f32 %v274_v38, %v266_v37  ;;  %v625_v38 = vld [vmem:[#allocation2 + $0x8] sm:$0x3] }
 0x219   :  { %1346 = vtanh.f32 %v276_v39 }
 0x223   :  { %v1347_v40 = vpop.eup %1346 }
 0x224   :  { %279 = vrot.lane.b32.xlu1 %v1347_v40, %s1530_s18 }
 0x296   :  { %v280_v41 = vpop.permute.xlu1 %279 }
 0x297   :  { %v1670_v42 = vmul.f32 %v1345_v33, %v280_v41 }
 0x299   :  { %297 = vrot.lane.b32.xlu0 %v1670_v42, %s1531_s3 }
 0x30b   :  { %v298_v43 = vpop.permute.xlu0 %297 }
 0x30c   :  { %1202 = vmatmul.mubr.msk.f32.vlgmr.msra.gmra.mrb[2].mxu0 %vm90_vm1, %v298_v43 }
 0x30d   :  { %1298 = vmatpush3.bf16.msra.mxu0 %v1632_v12  ;;  %1223 = vmatprep.mubr.msk.f32.mxu0 %vm1528_vm0, %v1529_v1 }
 0x30e   :  { %1299 = vmatprep.subr.bf16.mxu0 %v1527_v0 }
 0x311   :  { %1301 = vmatpush3.bf16.msra.mxu0 %v1639_v15 }
 0x312   :  { %1308 = vmatprep.subr.bf16.mxu0 %v1527_v0 }
 0x3df   :  { %v367_v45 = vpop.f32.mrb[2].mxu0 }
 0x3e0   :  { %v371_v46 = vadd.f32 %v367_v45, %v296_v44  ;;  %v1203_v47 = vpop.f32.mrb[3].mxu0 }
 0x3e2   :  { %1348 = vtanh.f32 %v371_v46  ;;  %v1112_v49 = vmul.f32 -1.442695, %v371_v46 }
 0x3e4   :  { %1350 = vpow2.f32 %v1112_v49 }
 0x3ec   :  { %v1349_v48 = vpop.eup %1348 }
 0x3ed   :  { %381 = vrot.lane.b32.xlu1 %v1349_v48, %s1530_s18 }
 0x3ee   :  { %v1351_v50 = vpop.eup %1350 }
 0x3ef   :  { %v375_v51 = vadd.f32 1.0, %v1351_v50 }
 0x3f1   :  { %1352 = vrcp.f32 %v375_v51 }
 0x3fb   :  { %v1353_v52 = vpop.eup %1352 }
 0x3fc   :  { %v379_v55 = vmul.f32 %v1353_v52, %v276_v39 }
 0x45f   :  { %v382_v53 = vpop.permute.xlu1 %381 }
 0x460   :  { %v384_v54 = vmul.f32 %v1353_v52, %v382_v53 }
 0x462   :  { %386 = vrot.lane.b32.xlu0 %v384_v54, %s1530_s18 }
 0x4d4   :  { %v387_v56 = vpop.permute.xlu0 %386 }
 0x4d5   :  { %v389_v57 = vadd.f32 %v387_v56, %v379_v55 }
 0x4d7   :  { %1354 = vtanh.f32 %v389_v57 }
 0x4e1   :  { %v1355_v58 = vpop.eup %1354 }
 0x4e2   :  { %392 = vrot.lane.b32.xlu1 %v1355_v58, %s1530_s18 }
 0x554   :  { %v393_v59 = vpop.permute.xlu1 %392 }
 0x555   :  { %v1684_v60 = vmul.f32 %v1353_v52, %v393_v59 }
 0x557   :  { %410 = vrot.lane.b32.xlu0 %v1684_v60, %s1531_s3 }
 0x5c9   :  { %v411_v61 = vpop.permute.xlu0 %410 }
 0x5ca   :  { %1213 = vmatmul.mubr.msk.f32.vlgmr.msra.gmra.mrb[2].mxu1 %vm90_vm1, %v411_v61 }
 0x5cb   :  { %1304 = vmatpush3.bf16.msra.mxu1 %v1632_v12  ;;  %1234 = vmatprep.mubr.msk.f32.mxu1 %vm1528_vm0, %v1529_v1 }
 0x5cc   :  { %1305 = vmatprep.subr.bf16.mxu1 %v1527_v0 }
 0x5cf   :  { %1307 = vmatpush3.bf16.msra.mxu1 %v1639_v15 }
 0x5d0   :  { %1314 = vmatprep.subr.bf16.mxu1 %v1527_v0 }
 0x69d   :  { %v480_v63 = vpop.f32.mrb[2].mxu1 }
 0x69e   :  { %v484_v2 = vadd.f32 %v480_v63, %v409_v62  ;;  %v1214_v3 = vpop.f32.mrb[3].mxu1 }
 0x6a0   :  { %1356 = vtanh.f32 %v484_v2  ;;  %v1114_v5 = vmul.f32 -1.442695, %v484_v2 }
 0x6a2   :  { %1358 = vpow2.f32 %v1114_v5 }
 0x6aa   :  { %v1357_v4 = vpop.eup %1356 }
 0x6ab   :  { %494 = vrot.lane.b32.xlu1 %v1357_v4, %s1530_s18 }
 0x6ac   :  { %v1359_v6 = vpop.eup %1358 }
 0x6ad   :  { %v488_v7 = vadd.f32 1.0, %v1359_v6 }
 0x6af   :  { %1360 = vrcp.f32 %v488_v7 }
 0x6b9   :  { %v1361_v8 = vpop.eup %1360 }
 0x6ba   :  { %v492_v11 = vmul.f32 %v1361_v8, %v389_v57  ;;  %v737_v57 = vld [vmem:[#allocation2 + $0xa] sm:$0x3] }
 0x71d   :  { %v495_v9 = vpop.permute.xlu1 %494 }
 0x71e   :  { %v497_v10 = vmul.f32 %v1361_v8, %v495_v9 }
 0x720   :  { %499 = vrot.lane.b32.xlu0 %v497_v10, %s1530_s18  ;;  %v849_v10 = vld [vmem:[#allocation2 + $0xc] sm:$0x3] }
 0x792   :  { %v500_v13 = vpop.permute.xlu0 %499 }
 0x793   :  { %v502_v14 = vadd.f32 %v500_v13, %v492_v11 }
 0x795   :  { %1362 = vtanh.f32 %v502_v14 }
 0x79f   :  { %v1363_v16 = vpop.eup %1362 }
 0x7a0   :  { %505 = vrot.lane.b32.xlu1 %v1363_v16, %s1530_s18 }
 0x812   :  { %v506_v17 = vpop.permute.xlu1 %505 }
 0x813   :  { %v1698_v18 = vmul.f32 %v1361_v8, %v506_v17 }
 0x815   :  { %513 = vrot.lane.b32.xlu0 %v1698_v18, %s1531_s3 }
 0x887   :  { %v514_v19 = vpop.permute.xlu0 %513 }
 0x888   :  { %1224 = vmatmul.mubr.msk.f32.vlgmr.msra.gmra.mrb[4].mxu0 %vm90_vm1, %v514_v19 }
 0x889   :  { %1310 = vmatpush3.bf16.msra.mxu0 %v1632_v12  ;;  %1245 = vmatprep.mubr.msk.f32.mxu0 %vm1528_vm0, %v1529_v1 }
 0x88a   :  { %1311 = vmatprep.subr.bf16.mxu0 %v1527_v0 }
 0x88d   :  { %1313 = vmatpush3.bf16.msra.mxu0 %v1639_v15 }
 0x88e   :  { %1320 = vmatprep.subr.bf16.mxu0 %v1527_v0 }
 0x95b   :  { %v583_v21 = vpop.f32.mrb[4].mxu0 }
 0x95c   :  { %v587_v22 = vadd.f32 %v583_v21, %v511_v20  ;;  %v1225_v23 = vpop.f32.mrb[5].mxu0 }
 0x95e   :  { %1364 = vtanh.f32 %v587_v22  ;;  %v1116_v25 = vmul.f32 -1.442695, %v587_v22 }
 0x960   :  { %1366 = vpow2.f32 %v1116_v25 }
 0x968   :  { %v1365_v24 = vpop.eup %1364 }
 0x969   :  { %597 = vrot.lane.b32.xlu1 %v1365_v24, %s1530_s18 }
 0x96a   :  { %v1367_v26 = vpop.eup %1366 }
 0x96b   :  { %v591_v27 = vadd.f32 1.0, %v1367_v26 }
 0x96d   :  { %1368 = vrcp.f32 %v591_v27 }
 0x977   :  { %v1369_v28 = vpop.eup %1368 }
 0x978   :  { %v595_v31 = vmul.f32 %v1369_v28, %v502_v14 }
 0x9db   :  { %v598_v29 = vpop.permute.xlu1 %597 }
 0x9dc   :  { %v600_v30 = vmul.f32 %v1369_v28, %v598_v29 }
 0x9de   :  { %602 = vrot.lane.b32.xlu0 %v600_v30, %s1530_s18 }
 0xa50   :  { %v603_v32 = vpop.permute.xlu0 %602 }
 0xa51   :  { %v605_v33 = vadd.f32 %v603_v32, %v595_v31  ;;  %v950_v31 = vld [vmem:[#allocation2 + $0xe] sm:$0x3] }
 0xa53   :  { %1370 = vtanh.f32 %v605_v33 }
 0xa5d   :  { %v1371_v34 = vpop.eup %1370 }
 0xa5e   :  { %608 = vrot.lane.b32.xlu1 %v1371_v34, %s1530_s18 }
 0xad0   :  { %v609_v35 = vpop.permute.xlu1 %608 }
 0xad1   :  { %v1712_v36 = vmul.f32 %v1369_v28, %v609_v35 }
 0xad3   :  { %626 = vrot.lane.b32.xlu0 %v1712_v36, %s1531_s3 }
 0xb45   :  { %v627_v37 = vpop.permute.xlu0 %626 }
 0xb46   :  { %1235 = vmatmul.mubr.msk.f32.vlgmr.msra.gmra.mrb[4].mxu1 %vm90_vm1, %v627_v37 }
 0xb47   :  { %1316 = vmatpush3.bf16.msra.mxu1 %v1632_v12  ;;  %1256 = vmatprep.mubr.msk.f32.mxu1 %vm1528_vm0, %v1529_v1 }
 0xb48   :  { %1317 = vmatprep.subr.bf16.mxu1 %v1527_v0 }
 0xb4b   :  { %1319 = vmatpush3.bf16.msra.mxu1 %v1639_v15 }
 0xc19   :  { %v696_v39 = vpop.f32.mrb[4].mxu1 }
 0xc1a   :  { %v700_v40 = vadd.f32 %v696_v39, %v625_v38  ;;  %v1236_v41 = vpop.f32.mrb[5].mxu1 }
 0xc1c   :  { %1372 = vtanh.f32 %v700_v40  ;;  %v1118_v44 = vmul.f32 -1.442695, %v700_v40  ;;  %v1532_v40 = vmov 1983009808  }
 0xc1d   :  { %v285_v41 = vunpack.c.l.s4 %v1532_v40 }
 0xc1e   :  { %1374 = vpow2.f32 %v1118_v44 }
 0xc1f   :  { %v286_v44 = vunpack.c.0.s8 %v285_v41 }
 0xc26   :  { %v1373_v43 = vpop.eup %1372 }
 0xc27   :  { %710 = vrot.lane.b32.xlu1 %v1373_v43, %s1530_s18  ;;  %v287_v43 = vlaneseq }
 0xc28   :  { %v1375_v45 = vpop.eup %1374 }
 0xc29   :  { %v704_v46 = vadd.f32 1.0, %v1375_v45  ;;  %v288_v45 = vshrl.u32 %v287_v43, 7 }
 0xc2b   :  { %1376 = vrcp.f32 %v704_v46 }
 0xc35   :  { %v1377_v47 = vpop.eup %1376 }
 0xc36   :  { %v708_v50 = vmul.f32 %v1377_v47, %v605_v33 }
 0xc99   :  { %v711_v48 = vpop.permute.xlu1 %710 }
 0xc9a   :  { %v713_v49 = vmul.f32 %v1377_v47, %v711_v48  ;;  %v289_v48 = vsub.s32 %v286_v44, %v288_v45 }
 0xc9c   :  { %715 = vrot.lane.b32.xlu0 %v713_v49, %s1530_s18 }
 0xd0e   :  { %v716_v51 = vpop.permute.xlu0 %715 }
 0xd0f   :  { %v718_v52 = vadd.f32 %v716_v51, %v708_v50  ;;  %v290_v50 = vrot.slane %v1670_v42, %v289_v48  ;;  %v403_v51 = vrot.slane %v1684_v60, %v289_v48 }
 0xd11   :  { %1378 = vtanh.f32 %v718_v52 }
 0xd1b   :  { %v1379_v53 = vpop.eup %1378 }
 0xd1c   :  { %721 = vrot.lane.b32.xlu1 %v1379_v53, %s1530_s18 }
 0xd8e   :  { %v722_v54 = vpop.permute.xlu1 %721 }
 0xd8f   :  { %v1725_v55 = vmul.f32 %v1377_v47, %v722_v54 }
 0xd91   :  { %738 = vrot.lane.b32.xlu0 %v1725_v55, %s1531_s3 }
 0xe03   :  { %v739_v56 = vpop.permute.xlu0 %738 }
 0xe04   :  { %1246 = vmatmul.mubr.msk.f32.vlgmr.msra.gmra.mrb[6].mxu0 %vm90_vm1, %v739_v56 }
 0xe05   :  { %1322 = vmatpush3.bf16.msra.mxu0 %v1632_v12  ;;  %1267 = vmatprep.mubr.msk.f32.mxu0 %vm1528_vm0, %v1529_v1 }
 0xe06   :  { %1323 = vmatprep.subr.bf16.mxu0 %v1527_v0 }
 0xe09   :  { %1325 = vmatpush3.bf16.msra.mxu0 %v1639_v15 }
 0xed7   :  { %v808_v58 = vpop.f32.mrb[6].mxu0 }
 0xed8   :  { %v812_v59 = vadd.f32 %v808_v58, %v737_v57  ;;  %v1247_v61 = vpop.f32.mrb[7].mxu0  ;;  %v732_v58 = vrot.slane %v1725_v55, %v289_v48 }
 0xeda   :  { %1380 = vtanh.f32 %v812_v59  ;;  %v1120_v63 = vmul.f32 -1.442695, %v812_v59 }
 0xedc   :  { %1382 = vpow2.f32 %v1120_v63 }
 0xee4   :  { %v1381_v62 = vpop.eup %1380 }
 0xee5   :  { %822 = vrot.lane.b32.xlu1 %v1381_v62, %s1530_s18 }
 0xee6   :  { %v1383_v2 = vpop.eup %1382 }
 0xee7   :  { %v816_v3 = vadd.f32 1.0, %v1383_v2 }
 0xee9   :  { %1384 = vrcp.f32 %v816_v3 }
 0xef3   :  { %v1385_v12 = vpop.eup %1384 }
 0xef4   :  { %v820_v0 = vmul.f32 %v1385_v12, %v718_v52  ;;  %v619_v52 = vrot.slane %v1712_v36, %v289_v48 }
 0xf57   :  { %v823_v4 = vpop.permute.xlu1 %822 }
 0xf58   :  { %v825_v1 = vmul.f32 %v1385_v12, %v823_v4 }
 0xf5a   :  { %827 = vrot.lane.b32.xlu0 %v825_v1, %s1530_s18 }
 0xfcc   :  { %v828_v15 = vpop.permute.xlu0 %827 }
 0xfcd   :  { %v830_v5 = vadd.f32 %v828_v15, %v820_v0 }
 0xfcf   :  { %1386 = vtanh.f32 %v830_v5 }
 0xfd9   :  { %v1387_v6 = vpop.eup %1386 }
 0xfda   :  { %833 = vrot.lane.b32.xlu1 %v1387_v6, %s1530_s18 }
0x104c   :  { %v834_v7 = vpop.permute.xlu1 %833 }
0x104d   :  { %v1738_v8 = vmul.f32 %v1385_v12, %v834_v7 }
0x104f   :  { %850 = vrot.lane.b32.xlu0 %v1738_v8, %s1531_s3  ;;  %v844_v59 = vrot.slane %v1738_v8, %v289_v48 }
0x10c1   :  { %v851_v9 = vpop.permute.xlu0 %850 }
0x10c2   :  { %1257 = vmatmul.mubr.msk.f32.vlgmr.msra.gmra.mrb[6].mxu1 %vm90_vm1, %v851_v9 }
0x1195   :  { %v920_v11 = vpop.f32.mrb[6].mxu1 }
0x1196   :  { %v924_v13 = vadd.f32 %v920_v11, %v849_v10  ;;  %v1258_v14 = vpop.f32.mrb[7].mxu1 }
0x1198   :  { %1388 = vtanh.f32 %v924_v13  ;;  %v1122_v17 = vmul.f32 -1.442695, %v924_v13 }
0x119a   :  { %1390 = vpow2.f32 %v1122_v17 }
0x11a2   :  { %v1389_v16 = vpop.eup %1388 }
0x11a3   :  { %934 = vrot.lane.b32.xlu1 %v1389_v16, %s1530_s18 }
0x11a4   :  { %v1391_v19 = vpop.eup %1390 }
0x11a5   :  { %v928_v20 = vadd.f32 1.0, %v1391_v19 }
0x11a7   :  { %1392 = vrcp.f32 %v928_v20 }
0x11b1   :  { %v1393_v21 = vpop.eup %1392 }
0x11b2   :  { %v932_v24 = vmul.f32 %v1393_v21, %v830_v5 }
0x1215   :  { %v935_v22 = vpop.permute.xlu1 %934 }
0x1216   :  { %v937_v23 = vmul.f32 %v1393_v21, %v935_v22 }
0x1218   :  { %939 = vrot.lane.b32.xlu0 %v937_v23, %s1530_s18 }
0x128a   :  { %v940_v25 = vpop.permute.xlu0 %939 }
0x128b   :  { %v942_v26 = vadd.f32 %v940_v25, %v932_v24 }
0x128d   :  { %1394 = vtanh.f32 %v942_v26 }
0x1297   :  { %v1395_v27 = vpop.eup %1394 }
0x1298   :  { %945 = vrot.lane.b32.xlu1 %v1395_v27, %s1530_s18 }
0x130a   :  { %v946_v28 = vpop.permute.xlu1 %945 }
0x130b   :  { %v1746_v29 = vmul.f32 %v1393_v21, %v946_v28 }
0x130d   :  { %952 = vrot.lane.b32.xlu0 %v1746_v29, %s1531_s3 }
0x137f   :  { %v953_v30 = vpop.permute.xlu0 %952 }
0x1380   :  { %1268 = vmatmul.mubr.msk.f32.vlgmr.msra.gmra.mrb[8].mxu0 %vm90_vm1, %v953_v30 }
0x1453   :  { %v1022_v32 = vpop.f32.mrb[8].mxu0 }
0x1454   :  { %v1026_v33 = vadd.f32 %v1022_v32, %v950_v31  ;;  %v1269_v34 = vpop.f32.mrb[9].mxu0 }
0x1456   :  { %1396 = vtanh.f32 %v1026_v33  ;;  %v1124_v37 = vmul.f32 -1.442695, %v1026_v33 }
0x1458   :  { %1398 = vpow2.f32 %v1124_v37 }
0x1460   :  { %v1397_v35 = vpop.eup %1396 }
0x1461   :  { %1036 = vrot.lane.b32.xlu1 %v1397_v35, %s1530_s18 }
0x1462   :  { %v1399_v38 = vpop.eup %1398 }
0x1463   :  { %v1030_v39 = vadd.f32 1.0, %v1399_v38 }
0x1465   :  { %1400 = vrcp.f32 %v1030_v39 }
0x146f   :  { %v1401_v46 = vpop.eup %1400 }
0x1470   :  { %v1034_v53 = vmul.f32 %v1401_v46, %v942_v26 }
0x14d3   :  { %v1037_v47 = vpop.permute.xlu1 %1036 }
0x14d4   :  { %v1039_v49 = vmul.f32 %v1401_v46, %v1037_v47 }
0x14d6   :  { %1041 = vrot.lane.b32.xlu0 %v1039_v49, %s1530_s18 }
0x14da   :  { %291 = vrot.lane.b32.xlu0 %v290_v50, %s1531_s3 }
0x14de   :  { %404 = vrot.lane.b32.xlu0 %v403_v51, %s1533_s5 }
0x14e2   :  { %620 = vrot.lane.b32.xlu0 %v619_v52, %s1530_s18 }
0x1548   :  { %v1042_v54 = vpop.permute.xlu0 %1041 }
0x1549   :  { %v1044_v56 = vadd.f32 %v1042_v54, %v1034_v53 }
0x154b   :  { %1402 = vtanh.f32 %v1044_v56  ;;  %1068 = vrot.lane.b32.xlu0 %v1044_v56, %s1533_s5 }
0x154c   :  { %v292_v57 = vpop.permute.xlu0 %291 }
0x154d   :  { %295 = vst.msk [vmem:[#allocation11] sm:$0x3] %vm73_vm2, %v292_v57 }
0x1550   :  { %v405_v42 = vpop.permute.xlu0 %404 }
0x1551   :  { %408 = vst.msk [vmem:[#allocation11] sm:$0x3] %vm407_vm3, %v405_v42 }
0x1552   :  { %510 = vst.msk [vmem:[#allocation11] sm:$0x3] %vm509_vm4, %v1698_v18 }
0x1554   :  { %v621_v60 = vpop.permute.xlu0 %620 }
0x1555   :  { %v1403_v36 = vpop.eup %1402  ;;  %624 = vst.msk [vmem:[#allocation11] sm:$0x3] %vm623_vm5, %v621_v60 }
0x1556   :  { %1047 = vrot.lane.b32.xlu1 %v1403_v36, %s1530_s18 }
0x155a   :  { %733 = vrot.lane.b32.xlu1 %v732_v58, %s1531_s3 }
0x155e   :  { %845 = vrot.lane.b32.xlu1 %v844_v59, %s1533_s5 }
0x15bd   :  { %v1069_v61 = vpop.permute.xlu0 %1068 }
0x15be   :  { %1071 = vst.msk [vmem:[#allocation4] sm:$0x3] %vm73_vm2, %v1069_v61  ;;  %1075 = vst.msk [vmem:[#allocation12] sm:$0x3] %vm73_vm2, %v1069_v61 }
0x15bf   :  { %1481 = shalt.err (!%p1478_p0)
}
0x15c0   :  { %s1482_s24 = scalar_lea.hbm %s1808_s7, 32 }
0x15c1   :  { %p1483_p1 = scmp.ne.s32.totalorder %s1808_s7, %s1482_s24  ;;  %p1486_p2 = scmp.lt.u32.totalorder %s1482_s24, %s1808_s7 }
0x15c3   :  { %p1488_p3 = pnand %p1486_p2, %p1483_p1 }
0x15c5   :  { %1491 = shalt.err (!%p1488_p3)
}
0x15c6   :  { %1095 = dma.vmem_to_hbm [thread:$0]  %s1093_s20, 32, %s1808_s7, [#allocation13]  }
0x15c7   :  { %s1535_s8 = smov [#allocation11]  }
0x15c8   :  { %v1048_v18 = vpop.permute.xlu1 %1047  ;;  %s1082_s9 = sshll.u32 %s1535_s8, 4  ;;  %s1083_s9 = int_to_ptr.vmem [resolvable:$true] %s1082_s9 }
0x15c9   :  { %v1050_v55 = vmul.f32 %v1401_v46, %v1048_v18  ;;  %s1492_s7 = scalar_lea.vmem %s1083_s9, 64  ;;  %p1497_p5 = scmp.lt.s32.totalorder %s1083_s9, %s1083_s9 }
0x15ca   :  { %p1493_p4 = scmp.ne.s32.totalorder %s1083_s9, %s1492_s7  ;;  %p1498_p6 = scmp.lt.s32.totalorder %s1492_s7, %s1492_s7 }
0x15cb   :  { %v1058_v62 = vrot.slane %v1050_v55, %v289_v48 }
0x15cc   :  { %v734_v63 = vpop.permute.xlu1 %733  ;;  %p1499_p7 = por %p1498_p6, %p1497_p5 }
0x15cd   :  { %736 = vst.msk [vmem:[#allocation11 + $0x2] sm:$0x3] %vm73_vm2, %v734_v63  ;;  %1059 = vrot.lane.b32.xlu1 %v1058_v62, %s1530_s18 }
0x15ce   :  { %p1500_p8 = pnand %p1499_p7, %p1493_p4 }
0x15d0   :  { %v846_v2 = vpop.permute.xlu1 %845 }
0x15d1   :  { %848 = vst.msk [vmem:[#allocation11 + $0x2] sm:$0x3] %vm407_vm3, %v846_v2  ;;  %1063 = vrot.lane.b32.xlu1 %v1050_v55, %s1531_s3 }
0x15d2   :  { %949 = vst.msk [vmem:[#allocation11 + $0x2] sm:$0x3] %vm509_vm4, %v1746_v29 }
0x163f   :  { %v1060_v3 = vpop.permute.xlu1 %1059 }
0x1640   :  { %1062 = vst.msk [vmem:[#allocation11 + $0x2] sm:$0x3] %vm623_vm5, %v1060_v3 }
0x1641   :  { %1503 = shalt.err (!%p1500_p8)
}
0x1642   :  { %s1504_s12 = scalar_lea.hbm %s1807_s6, 64 }
0x1643   :  { %p1505_p9 = scmp.ne.s32.totalorder %s1807_s6, %s1504_s12  ;;  %p1508_p10 = scmp.lt.u32.totalorder %s1504_s12, %s1807_s6 }
0x1645   :  { %p1510_p11 = pnand %p1508_p10, %p1505_p9 }
0x1647   :  { %1513 = shalt.err (!%p1510_p11)
}
0x1648   :  { %1085 = dma.vmem_to_hbm [thread:$0]  %s1083_s9, 64, %s1807_s6, [#allocation7]   ;;  %v1064_v12 = vpop.permute.xlu1 %1063 }
0x1649   :  { %1066 = vst.msk [vmem:[#allocation3] sm:$0x3] %vm73_vm2, %v1064_v12 }
0x164a   :  { %1518 = dma.done.wait [#allocation7], 64  }
0x164b   :  { %1519 = vsyncadd [#allocation7], 4294967232 }
0x164c   :  { %1520 = dma.done.wait [#allocation13], 32  }
0x164d   :  { %1521 = vsyncadd [#allocation13], 4294967264 }
0x164e   :  { %1102 = vsyncpa [#allocation6], 1 }
0x164f   :  { %1103 = vsyncpa [#allocation9], 1 }
0x1650   :  { %1104 = vsyncpa [#allocation7], 1 }
0x1651   :  { %1105 = vsyncpa [#allocation13], 1 }

</bundles_post_ra>
